<compile_context>
chip_gen: v6e
topology: v6e:2x2x1
jax: 0.10.0
libtpu: 0.0.40
codegen_flags: <defaults>
</compile_context>

<pallas_src>
import numpy as np
import jax
import jax.numpy as jnp
from jax import lax
from jax.experimental import pallas as pl
from jax.experimental.pallas import tpu as pltpu


def _fused_kernel(p_ref, w1_ref, b1_ref, w2_ref, b2_ref, o_ref):
    # conv5x5 as matmul on the already-pooled im2col patches:
    #   (20, 25) @ (25, HW2) -> (20, HW2), + b1
    h = jnp.dot(w1_ref[...], p_ref[...],
                preferred_element_type=jnp.float32) + b1_ref[...]
    # 1x1 conv: (128, 20) @ (20, HW2) -> (128, HW2), + b2, ReLU
    y = jnp.dot(w2_ref[...], h,
                preferred_element_type=jnp.float32) + b2_ref[...]
    o_ref[...] = jnp.maximum(y, 0.0)


def _model_forward(x, w1, b1, w2, b2):
    """x: (1, 1, H, W) float32 NCHW.  Returns (1, 128 * H2 * W2) float32."""
    _, _, H, W = x.shape
    K = 5
    H1, W1 = H - K + 1, W - K + 1            # conv5x5 'valid' output
    H2, W2 = H1 // 2, W1 // 2                # after AvgPool2d(2) (floor)
    C1, C2 = w1.shape[0], w2.shape[0]        # 20, 128

    # ---- pooled, channel-major im2col of the single-channel input ----
    # Pooling is linear (windows sum to 1) => it commutes with the 5x5 conv
    # and its bias, so we pool the shifted image slices directly.
    x2 = x[0, 0]                                              # (H, W)
    cols = []
    for ky in range(K):
        for kx in range(K):
            s = x2[ky:ky + H1, kx:kx + W1]                    # (H1, W1)
            s = s[:2 * H2, :2 * W2]                           # floor pooling
            cols.append(0.25 * (s[0::2, 0::2] + s[0::2, 1::2]
                                + s[1::2, 0::2] + s[1::2, 1::2]))
    patches = jnp.stack(cols, axis=0).reshape(K * K, H2 * W2)  # (25, HW2)

    # ---- weight / bias matrices (no reassociation of the weights) ----
    w1m = w1.reshape(C1, K * K)              # (20, 25)
    w2m = w2.reshape(C2, C1)                 # (128, 20)
    b1m = b1.reshape(C1, 1)                  # (20, 1)
    b2m = b2.reshape(C2, 1)                  # (128, 1)

    # ---- Pallas kernel: single invocation, everything resident in VMEM ----
    hw2 = H2 * W2
    flops = 2 * C1 * (K * K) * hw2 + 2 * C2 * C1 * hw2
    bytes_accessed = 4 * ((K * K) * hw2 + C1 * (K * K) + C1
                          + C2 * C1 + C2 + C2 * hw2)
    vmem_spec = pl.BlockSpec(memory_space=pltpu.MemorySpace.VMEM)

    out = pl.pallas_call(
        _fused_kernel,
        out_shape=jax.ShapeDtypeStruct((C2, hw2), jnp.float32),
        in_specs=[vmem_spec] * 5,
        out_specs=vmem_spec,
        cost_estimate=pl.CostEstimate(flops=flops, transcendentals=0,
                                      bytes_accessed=bytes_accessed),
    )(patches, w1m, b1m, w2m, b2m)           # (128, H2*W2), channel-major

    # channel-major (C2, H2*W2) already matches torch's
    # (1, C2, H2, W2).view(1, -1) -> free reshape.
    return out.reshape(1, -1)


model_forward = jax.jit(_model_forward)


def _reference(x, w1, b1, w2, b2):
    """Pure-JAX reference matching the PyTorch forward."""
    v1 = lax.conv_general_dilated(
        x, w1, window_strides=(1, 1), padding="VALID",
        dimension_numbers=("NCHW", "OIHW", "NCHW"),
    ) + b1.reshape(1, -1, 1, 1)
    v2 = lax.reduce_window(
        v1, 0.0, lax.add, (1, 1, 2, 2), (1, 1, 2, 2), "VALID") / 4.0
    v3 = lax.conv_general_dilated(
        v2, w2, window_strides=(1, 1), padding="VALID",
        dimension_numbers=("NCHW", "OIHW", "NCHW"),
    ) + b2.reshape(1, -1, 1, 1)
    v4 = jnp.maximum(v3, 0.0)
    return v4.reshape(1, -1)


if __name__ == "__main__":
    key = jax.random.PRNGKey(0)
    k_x, k_w1, k_b1, k_w2, k_b2 = jax.random.split(key, 5)

    # Small spatial size consistent with the module (1 input channel).
    # 36x36 -> conv out 32x32 -> pooled 16x16 (lane-dense 256-wide output).
    H = W = 36
    x = jax.random.normal(k_x, (1, 1, H, W), dtype=jnp.float32)

    # Deterministic parameter init (shapes from the module's __init__).
    w1 = 0.1 * jax.random.normal(k_w1, (20, 1, 5, 5), dtype=jnp.float32)
    b1 = 0.1 * jax.random.normal(k_b1, (20,), dtype=jnp.float32)
    w2 = 0.1 * jax.random.normal(k_w2, (128, 20, 1, 1), dtype=jnp.float32)
    b2 = 0.1 * jax.random.normal(k_b2, (128,), dtype=jnp.float32)

    out = jax.block_until_ready(model_forward(x, w1, b1, w2, b2))
    ref = jax.block_until_ready(_reference(x, w1, b1, w2, b2))

    assert out.shape == ref.shape, (out.shape, ref.shape)
    np.testing.assert_allclose(np.asarray(out), np.asarray(ref),
                               rtol=1e-4, atol=1e-4)
    print("KERNEL_OK")
</pallas_src>

<mosaic_0001>
module attributes {stable_mosaic.version = 11 : i64} {
  func.func @_fused_kernel(%arg0: memref<25x256xf32, #tpu.memory_space<vmem>>, %arg1: memref<20x25xf32, #tpu.memory_space<vmem>>, %arg2: memref<20x1xf32, #tpu.memory_space<vmem>>, %arg3: memref<128x20xf32, #tpu.memory_space<vmem>>, %arg4: memref<128x1xf32, #tpu.memory_space<vmem>>, %arg5: memref<128x256xf32, #tpu.memory_space<vmem>>) attributes {dimension_semantics = [], scalar_prefetch = 0 : i64, scratch_operands = 0 : i64, tpu.core_type = #tpu.core_type<tc>} {
    %c0 = arith.constant 0 : index
    %c0_0 = arith.constant 0 : index
    %0 = vector.load %arg1[%c0, %c0_0] : memref<20x25xf32, #tpu.memory_space<vmem>>, vector<20x25xf32>
    %c0_1 = arith.constant 0 : index
    %c0_2 = arith.constant 0 : index
    %1 = vector.load %arg0[%c0_1, %c0_2] : memref<25x256xf32, #tpu.memory_space<vmem>>, vector<25x256xf32>
    %cst = arith.constant dense<0.000000e+00> : vector<20x256xf32>
    %2 = tpu.matmul %0, %1, %cst {dimension_numbers = #tpu.dot_dimension_numbers<[1], [0], [0], [1], [0, 0, 1, 1], [], []>} : vector<20x25xf32>, vector<25x256xf32>, vector<20x256xf32> -> vector<20x256xf32>
    %c0_3 = arith.constant 0 : index
    %c0_4 = arith.constant 0 : index
    %3 = vector.load %arg2[%c0_3, %c0_4] : memref<20x1xf32, #tpu.memory_space<vmem>>, vector<20x1xf32>
    %4 = vector.broadcast %3 : vector<20x1xf32> to vector<20x256xf32>
    %5 = arith.addf %2, %4 : vector<20x256xf32>
    %c0_5 = arith.constant 0 : index
    %c0_6 = arith.constant 0 : index
    %6 = vector.load %arg3[%c0_5, %c0_6] : memref<128x20xf32, #tpu.memory_space<vmem>>, vector<128x20xf32>
    %cst_7 = arith.constant dense<0.000000e+00> : vector<128x256xf32>
    %7 = tpu.matmul %6, %5, %cst_7 {dimension_numbers = #tpu.dot_dimension_numbers<[1], [0], [0], [1], [0, 0, 1, 1], [], []>} : vector<128x20xf32>, vector<20x256xf32>, vector<128x256xf32> -> vector<128x256xf32>
    %c0_8 = arith.constant 0 : index
    %c0_9 = arith.constant 0 : index
    %8 = vector.load %arg4[%c0_8, %c0_9] : memref<128x1xf32, #tpu.memory_space<vmem>>, vector<128x1xf32>
    %9 = vector.broadcast %8 : vector<128x1xf32> to vector<128x256xf32>
    %10 = arith.addf %7, %9 : vector<128x256xf32>
    %cst_10 = arith.constant 0.000000e+00 : f32
    %11 = vector.broadcast %cst_10 : f32 to vector<128x256xf32>
    %12 = arith.maximumf %10, %11 : vector<128x256xf32>
    %c0_11 = arith.constant 0 : index
    %c0_12 = arith.constant 0 : index
    %13 = vector.load %arg5[%c0_11, %c0_12] : memref<128x256xf32, #tpu.memory_space<vmem>>, vector<128x256xf32>
    tpu.vector_store %arg5[%c0_11, %c0_12], %12 {strides = array<i32>} : memref<128x256xf32, #tpu.memory_space<vmem>>, vector<128x256xf32>,
    return
  }
}

</mosaic_0001>

<bundles_post_ra>
// kernel: _model_forward.1
= control target key start
LH: loop header
LB: loop body
LE: loop exit
PB: predicated region body
PF: predicated region fallthrough
CT: control target
= control target key end

     0   :  { %vm59_vm0 = vcmask 1040384   ;;  %v579_v3 = vmov 0.0   ;;  %v580_v4 = vmov 0   ;;  %vm49_vm1 = vcmask 203776   ;;  %s895_s0 = inlined_call_operand.vmem [shape: f32[25,256], index: 0, kind: input, shape index: {}]   ;;  %s896_s2 = inlined_call_operand.vmem [shape: f32[20,1], index: 2, kind: input, shape index: {}]   ;;  %s897_s1 = inlined_call_operand.vmem [shape: f32[20,25], index: 1, kind: input, shape index: {}]   ;;  %s898_s4 = inlined_call_operand.vmem [shape: f32[128,1], index: 4, kind: input, shape index: {}]   ;;  %s899_s3 = inlined_call_operand.vmem [shape: f32[128,20], index: 3, kind: input, shape index: {}]   ;;  %s900_s5 = inlined_call_operand.vmem [shape: f32[128,256], index: 5, kind: output, shape index: {}]  }
   0x1   :  { %v30_v0 = vld [vmem:[%s895_s0 + $0x38] sm:$0x1]  ;;  %v29_v1 = vld [vmem:[%s895_s0 + $0x30] sm:$0x1]  ;;  %v28_v2 = vld [vmem:[%s895_s0 + $0x28] sm:$0xff]  ;;  %130 = vmatprep.mubr.f32.mxu0 %v579_v3  ;;  %577 = vset.pattern.permute.xlu0 %v580_v4  ;;  %vm310_vm2 = vcmask 1043456  }
   0x2   :  { %546 = vmatprep.subr.msk.mxu0 %vm59_vm0, %v30_v0  ;;  %v27_v5 = vld [vmem:[%s895_s0 + $0x20] sm:$0xff]  ;;  %578 = vset.pattern.permute.xlu1 %v580_v4  ;;  %v26_v6 = vld [vmem:[%s895_s0 + $0x18] sm:$0xff]  ;;  %v25_v7 = vld [vmem:[%s895_s0 + $0x10] sm:$0xff]  ;;  %vm261_vm3 = vcmask 162816  }
   0x3   :  { %547 = vmatpush1.msk.msra.mxu0 %vm59_vm0, %v29_v1  ;;  %417 = vmatprep.mubr.f32.mxu1 %v579_v3  ;;  %v33_v8 = vld [vmem:[%s896_s2 + $0x10] sm:$0xf]  ;;  %v24_v9 = vld [vmem:[%s895_s0 + $0x8] sm:$0xff]  ;;  %v31_v10 = vld [vmem:[%s896_s2] sm:$0xff] }
   0x4   :  { %92 = vmatprep.subr.mxu0 %v28_v2  ;;  %46 = vperm.xlu0 %577, %v33_v8   ;;  %v23_v11 = vld [vmem:[%s895_s0] sm:$0xff]  ;;  %v32_v12 = vld [vmem:[%s896_s2 + $0x8] sm:$0xff]  ;;  %v167_v17 = vld [vmem:[%s898_s4 + $0x10] sm:$0xff] }
   0x5   :  { %93 = vmatpush1.msra.mxu0 %v27_v5  ;;  %36 = vperm.xlu1 %578, %v31_v10   ;;  %v20_v13 = vld [vmem:[%s897_s1] sm:$0xff]  ;;  %v166_v15 = vld [vmem:[%s898_s4 + $0x8] sm:$0xff]  ;;  %v168_v18 = vld [vmem:[%s898_s4 + $0x18] sm:$0xff] }
   0x6   :  { %94 = vmatprep.subr.mxu0 %v26_v6  ;;  %v165_v14 = vld [vmem:[%s898_s4] sm:$0xff]  ;;  %v21_v16 = vld [vmem:[%s897_s1 + $0x8] sm:$0xff]  ;;  %v22_v19 = vld [vmem:[%s897_s1 + $0x10] sm:$0xf] }
   0x7   :  { %95 = vmatpush1.msra.mxu0 %v25_v7  ;;  %v169_v20 = vld [vmem:[%s898_s4 + $0x20] sm:$0xff]  ;;  %v170_v21 = vld [vmem:[%s898_s4 + $0x28] sm:$0xff]  ;;  %v171_v22 = vld [vmem:[%s898_s4 + $0x30] sm:$0xff] }
   0x8   :  { %96 = vmatprep.subr.mxu0 %v24_v9  ;;  %41 = vperm.xlu0 %577, %v32_v12   ;;  %v172_v23 = vld [vmem:[%s898_s4 + $0x38] sm:$0xff]  ;;  %v173_v24 = vld [vmem:[%s898_s4 + $0x40] sm:$0xff]  ;;  %v174_v25 = vld [vmem:[%s898_s4 + $0x48] sm:$0xff] }
   0x9   :  { %97 = vmatpush1.msra.mxu0 %v23_v11  ;;  %183 = vperm.xlu1 %578, %v165_v14   ;;  %v175_v26 = vld [vmem:[%s898_s4 + $0x50] sm:$0xff]  ;;  %v176_v27 = vld [vmem:[%s898_s4 + $0x58] sm:$0xff]  ;;  %v177_v28 = vld [vmem:[%s898_s4 + $0x60] sm:$0xff] }
   0xa   :  { %548 = vmatmul.mubr.msk.f32.vlgmr.msra.gmra.mxu0 %vm49_vm1, %v20_v13  ;;  %v178_v29 = vld [vmem:[%s898_s4 + $0x68] sm:$0xff]  ;;  %v179_v30 = vld [vmem:[%s898_s4 + $0x70] sm:$0xff]  ;;  %v180_v31 = vld [vmem:[%s898_s4 + $0x78] sm:$0xff] }
   0xb   :  { %136 = vmatprep.mubr.f32.mxu0 %v579_v3  ;;  %v149_v47 = vld [vmem:[%s899_s3] sm:$0xff]  ;;  %v155_v48 = vld [vmem:[%s899_s3 + $0x30] sm:$0xff]  ;;  %v150_v49 = vld [vmem:[%s899_s3 + $0x8] sm:$0xff] }
   0xc   :  { %188 = vperm.xlu0 %577, %v166_v15   ;;  %v156_v50 = vld [vmem:[%s899_s3 + $0x38] sm:$0xff]  ;;  %v151_v51 = vld [vmem:[%s899_s3 + $0x10] sm:$0xff]  ;;  %v157_v52 = vld [vmem:[%s899_s3 + $0x40] sm:$0xff] }
   0xd   :  { %193 = vperm.xlu1 %578, %v167_v17   ;;  %v152_v53 = vld [vmem:[%s899_s3 + $0x18] sm:$0xff]  ;;  %v158_v54 = vld [vmem:[%s899_s3 + $0x48] sm:$0xff]  ;;  %v153_v55 = vld [vmem:[%s899_s3 + $0x20] sm:$0xff] }
   0xe   :  { %549 = vmatmul.mubr.msk.f32.gmra.mxu0 %vm49_vm1, %v21_v16  ;;  %v159_v56 = vld [vmem:[%s899_s3 + $0x50] sm:$0xff]  ;;  %v154_v57 = vld [vmem:[%s899_s3 + $0x28] sm:$0xff]  ;;  %v160_v58 = vld [vmem:[%s899_s3 + $0x58] sm:$0xff] }
   0xf   :  { %142 = vmatprep.mubr.f32.mxu0 %v579_v3  ;;  %v161_v59 = vld [vmem:[%s899_s3 + $0x60] sm:$0xff]  ;;  %v162_v60 = vld [vmem:[%s899_s3 + $0x68] sm:$0xff]  ;;  %v163_v61 = vld [vmem:[%s899_s3 + $0x70] sm:$0xff] }
  0x10   :  { %198 = vperm.xlu0 %577, %v168_v18   ;;  %v164_v62 = vld [vmem:[%s899_s3 + $0x78] sm:$0xff] }
  0x11   :  { %203 = vperm.xlu1 %578, %v169_v20  }
  0x12   :  { %550 = vmatmul.mubr.msk.f32.gmra.mxu0 %vm49_vm1, %v22_v19 }
  0x13   :  { %381 = vmatprep.mubr.f32.mxu0 %v579_v3 }
  0x14   :  { %208 = vperm.xlu0 %577, %v170_v21  }
  0x15   :  { %213 = vperm.xlu1 %578, %v171_v22  }
  0x18   :  { %218 = vperm.xlu0 %577, %v172_v23  }
  0x19   :  { %223 = vperm.xlu1 %578, %v173_v24  }
  0x1c   :  { %228 = vperm.xlu0 %577, %v174_v25  }
  0x1d   :  { %233 = vperm.xlu1 %578, %v175_v26  }
  0x20   :  { %238 = vperm.xlu0 %577, %v176_v27  }
  0x21   :  { %243 = vperm.xlu1 %578, %v177_v28  }
  0x24   :  { %248 = vperm.xlu0 %577, %v178_v29  }
  0x25   :  { %253 = vperm.xlu1 %578, %v179_v30  }
  0x28   :  { %258 = vperm.xlu0 %577, %v180_v31  }
  0x7f   :  { %v47_v35 = vpop.permute.xlu0 %46 }
  0x80   :  { %v37_v43 = vpop.permute.xlu1 %36 }
  0x83   :  { %v42_v40 = vpop.permute.xlu0 %41 }
  0x84   :  { %v184_v63 = vpop.permute.xlu1 %183 }
  0x87   :  { %v189_v0 = vpop.permute.xlu0 %188 }
  0x88   :  { %v194_v1 = vpop.permute.xlu1 %193 }
  0x8b   :  { %v787_v2 = vpop.permute.xlu0 %198 }
  0x8c   :  { %v789_v4 = vpop.permute.xlu1 %203 }
  0x8f   :  { %v791_v5 = vpop.permute.xlu0 %208 }
  0x90   :  { %v214_v6 = vpop.permute.xlu1 %213 }
  0x93   :  { %v219_v12 = vpop.permute.xlu0 %218 }
  0x94   :  { %v224_v25 = vpop.permute.xlu1 %223 }
  0xca   :  { %v132_v32 = vpop.f32.mrf.mxu0 }
  0xcb   :  { %v133_v46 = vadd.f32 %v132_v32, %v37_v43 }
  0xcc   :  { %v134_v33 = vpop.f32.mrf.mxu0 }
  0xcd   :  { %v135_v45 = vadd.f32 %v134_v33, %v37_v43 }
  0xce   :  { %v138_v34 = vpop.f32.mrf.mxu0 }
  0xcf   :  { %v139_v44 = vadd.f32 %v138_v34, %v42_v40 }
  0xd0   :  { %v140_v36 = vpop.f32.mrf.mxu0 }
  0xd1   :  { %v141_v42 = vadd.f32 %v140_v36, %v42_v40 }
  0xd2   :  { %v144_v37 = vpop.f32.mrf.mxu0 }
  0xd3   :  { %v145_v41 = vadd.f32 %v144_v37, %v47_v35 }
  0xd4   :  { %v146_v38 = vpop.f32.mrf.mxu0 }
  0xd5   :  { %v147_v39 = vadd.f32 %v146_v38, %v47_v35  ;;  %v229_v38 = vpop.permute.xlu0 %228 }
  0xd7   :  { %551 = vmatprep.subr.msk.mxu0 %vm310_vm2, %v147_v39  ;;  %569 = vmatprep.subr.msk.mxu1 %vm310_vm2, %v147_v39 }
  0xd8   :  { %552 = vmatpush1.msk.msra.mxu0 %vm310_vm2, %v145_v41  ;;  %572 = vmatpush1.msk.msra.mxu1 %vm310_vm2, %v145_v41 }
  0xd9   :  { %345 = vmatprep.subr.mxu0 %v141_v42  ;;  %570 = vmatprep.subr.mxu1 %v141_v42 }
  0xda   :  { %346 = vmatpush1.msra.mxu0 %v139_v44  ;;  %573 = vmatpush1.msra.mxu1 %v139_v44 }
  0xdb   :  { %347 = vmatprep.subr.mxu0 %v135_v45  ;;  %571 = vmatprep.subr.mxu1 %v135_v45 }
  0xdc   :  { %348 = vmatpush1.msra.mxu0 %v133_v46  ;;  %574 = vmatpush1.msra.mxu1 %v133_v46 }
  0xdd   :  { %553 = vmatmul.mubr.msk.f32.vlgmr.msra.gmra.mxu0 %vm261_vm3, %v149_v47  ;;  %559 = vmatmul.mubr.msk.f32.vlgmr.msra.gmra.mxu1 %vm261_vm3, %v155_v48 }
  0xde   :  { %387 = vmatprep.mubr.f32.mxu0 %v579_v3  ;;  %423 = vmatprep.mubr.f32.mxu1 %v579_v3 }
  0xe1   :  { %554 = vmatmul.mubr.msk.f32.gmra.mxu0 %vm261_vm3, %v150_v49  ;;  %560 = vmatmul.mubr.msk.f32.gmra.mxu1 %vm261_vm3, %v156_v50 }
  0xe2   :  { %393 = vmatprep.mubr.f32.mxu0 %v579_v3  ;;  %429 = vmatprep.mubr.f32.mxu1 %v579_v3 }
  0xe5   :  { %555 = vmatmul.mubr.msk.f32.gmra.mxu0 %vm261_vm3, %v151_v51  ;;  %561 = vmatmul.mubr.msk.f32.gmra.mxu1 %vm261_vm3, %v157_v52  ;;  %v234_v51 = vpop.permute.xlu1 %233 }
  0xe6   :  { %399 = vmatprep.mubr.f32.mxu0 %v579_v3  ;;  %435 = vmatprep.mubr.f32.mxu1 %v579_v3 }
  0xe9   :  { %556 = vmatmul.mubr.msk.f32.gmra.mxu0 %vm261_vm3, %v152_v53  ;;  %562 = vmatmul.mubr.msk.f32.gmra.mxu1 %vm261_vm3, %v158_v54 }
  0xea   :  { %405 = vmatprep.mubr.f32.mxu0 %v579_v3  ;;  %441 = vmatprep.mubr.f32.mxu1 %v579_v3 }
  0xed   :  { %557 = vmatmul.mubr.msk.f32.gmra.mxu0 %vm261_vm3, %v153_v55  ;;  %563 = vmatmul.mubr.msk.f32.gmra.mxu1 %vm261_vm3, %v159_v56 }
  0xee   :  { %411 = vmatprep.mubr.f32.mxu0 %v579_v3  ;;  %447 = vmatprep.mubr.f32.mxu1 %v579_v3 }
  0xf1   :  { %558 = vmatmul.mubr.msk.f32.gmra.mxu0 %vm261_vm3, %v154_v57  ;;  %564 = vmatmul.mubr.msk.f32.gmra.mxu1 %vm261_vm3, %v160_v58 }
  0xf2   :  { %453 = vmatprep.mubr.f32.mxu1 %v579_v3 }
  0xf5   :  { %565 = vmatmul.mubr.msk.f32.gmra.mxu1 %vm261_vm3, %v161_v59 }
  0xf6   :  { %459 = vmatprep.mubr.f32.mxu1 %v579_v3 }
  0xf9   :  { %566 = vmatmul.mubr.msk.f32.gmra.mxu1 %vm261_vm3, %v162_v60 }
  0xfa   :  { %465 = vmatprep.mubr.f32.mxu1 %v579_v3 }
  0xfd   :  { %567 = vmatmul.mubr.msk.f32.gmra.mxu1 %vm261_vm3, %v163_v61 }
  0xfe   :  { %471 = vmatprep.mubr.f32.mxu1 %v579_v3 }
 0x101   :  { %568 = vmatmul.mubr.msk.f32.gmra.mxu1 %vm261_vm3, %v164_v62 }
 0x19d   :  { %v383_v7 = vpop.f32.mrf.mxu0  ;;  %v419_v8 = vpop.f32.mrf.mxu1 }
 0x19e   :  { %v384_v9 = vadd.f32 %v383_v7, %v184_v63  ;;  %v420_v3 = vadd.f32 %v419_v8, %v214_v6 }
 0x19f   :  { %v385_v10 = vpop.f32.mrf.mxu0  ;;  %v421_v11 = vpop.f32.mrf.mxu1 }
 0x1a0   :  { %v478_v13 = vmax.f32 %v384_v9, 0.0  ;;  %v490_v14 = vmax.f32 %v420_v3, 0.0  ;;  %v386_v15 = vadd.f32 %v385_v10, %v184_v63  ;;  %v422_v16 = vadd.f32 %v421_v11, %v214_v6 }
 0x1a1   :  { %v389_v17 = vpop.f32.mrf.mxu0  ;;  %v425_v18 = vpop.f32.mrf.mxu1 }
 0x1a2   :  { %510 = vst [vmem:[%s900_s5] sm:$0xff] %v478_v13  ;;  %522 = vst [vmem:[%s900_s5 + $0x60] sm:$0xff] %v490_v14  ;;  %v479_v19 = vmax.f32 %v386_v15, 0.0  ;;  %v491_v20 = vmax.f32 %v422_v16, 0.0  ;;  %v390_v21 = vadd.f32 %v389_v17, %v189_v0  ;;  %v426_v22 = vadd.f32 %v425_v18, %v219_v12  ;;  %v244_v18 = vpop.permute.xlu1 %243 }
 0x1a3   :  { %v391_v23 = vpop.f32.mrf.mxu0  ;;  %v427_v24 = vpop.f32.mrf.mxu1 }
 0x1a4   :  { %511 = vst [vmem:[%s900_s5 + $0x8] sm:$0xff] %v479_v19  ;;  %523 = vst [vmem:[%s900_s5 + $0x68] sm:$0xff] %v491_v20  ;;  %v480_v26 = vmax.f32 %v390_v21, 0.0  ;;  %v492_v27 = vmax.f32 %v426_v22, 0.0  ;;  %v392_v28 = vadd.f32 %v391_v23, %v189_v0  ;;  %v428_v29 = vadd.f32 %v427_v24, %v219_v12  ;;  %v239_v0 = vpop.permute.xlu0 %238 }
 0x1a5   :  { %v395_v30 = vpop.f32.mrf.mxu0  ;;  %v431_v31 = vpop.f32.mrf.mxu1 }
 0x1a6   :  { %512 = vst [vmem:[%s900_s5 + $0x10] sm:$0xff] %v480_v26  ;;  %524 = vst [vmem:[%s900_s5 + $0x70] sm:$0xff] %v492_v27  ;;  %v481_v32 = vmax.f32 %v392_v28, 0.0  ;;  %v493_v33 = vmax.f32 %v428_v29, 0.0  ;;  %v396_v34 = vadd.f32 %v395_v30, %v194_v1  ;;  %v432_v35 = vadd.f32 %v431_v31, %v224_v25 }
 0x1a7   :  { %v397_v36 = vpop.f32.mrf.mxu0  ;;  %v433_v37 = vpop.f32.mrf.mxu1 }
 0x1a8   :  { %513 = vst [vmem:[%s900_s5 + $0x18] sm:$0xff] %v481_v32  ;;  %525 = vst [vmem:[%s900_s5 + $0x78] sm:$0xff] %v493_v33  ;;  %v482_v39 = vmax.f32 %v396_v34, 0.0  ;;  %v494_v40 = vmax.f32 %v432_v35, 0.0  ;;  %v398_v41 = vadd.f32 %v397_v36, %v194_v1  ;;  %v434_v42 = vadd.f32 %v433_v37, %v224_v25  ;;  %v249_v25 = vpop.permute.xlu0 %248  ;;  %v254_v32 = vpop.permute.xlu1 %253 }
 0x1a9   :  { %v401_v43 = vpop.f32.mrf.mxu0  ;;  %v437_v44 = vpop.f32.mrf.mxu1 }
 0x1aa   :  { %514 = vst [vmem:[%s900_s5 + $0x20] sm:$0xff] %v482_v39  ;;  %526 = vst [vmem:[%s900_s5 + $0x80] sm:$0xff] %v494_v40  ;;  %v483_v45 = vmax.f32 %v398_v41, 0.0  ;;  %v495_v46 = vmax.f32 %v434_v42, 0.0  ;;  %v402_v47 = vadd.f32 %v401_v43, %v787_v2  ;;  %v438_v48 = vadd.f32 %v437_v44, %v229_v38 }
 0x1ab   :  { %v403_v49 = vpop.f32.mrf.mxu0  ;;  %v439_v50 = vpop.f32.mrf.mxu1 }
 0x1ac   :  { %515 = vst [vmem:[%s900_s5 + $0x28] sm:$0xff] %v483_v45  ;;  %527 = vst [vmem:[%s900_s5 + $0x88] sm:$0xff] %v495_v46  ;;  %v484_v52 = vmax.f32 %v402_v47, 0.0  ;;  %v496_v53 = vmax.f32 %v438_v48, 0.0  ;;  %v404_v54 = vadd.f32 %v403_v49, %v787_v2  ;;  %v440_v55 = vadd.f32 %v439_v50, %v229_v38  ;;  %v259_v39 = vpop.permute.xlu0 %258 }
 0x1ad   :  { %v407_v56 = vpop.f32.mrf.mxu0  ;;  %v443_v57 = vpop.f32.mrf.mxu1 }
 0x1ae   :  { %516 = vst [vmem:[%s900_s5 + $0x30] sm:$0xff] %v484_v52  ;;  %528 = vst [vmem:[%s900_s5 + $0x90] sm:$0xff] %v496_v53  ;;  %v485_v58 = vmax.f32 %v404_v54, 0.0  ;;  %v497_v59 = vmax.f32 %v440_v55, 0.0  ;;  %v408_v60 = vadd.f32 %v407_v56, %v789_v4  ;;  %v444_v61 = vadd.f32 %v443_v57, %v234_v51 }
 0x1af   :  { %v409_v62 = vpop.f32.mrf.mxu0  ;;  %v445_v63 = vpop.f32.mrf.mxu1 }
 0x1b0   :  { %517 = vst [vmem:[%s900_s5 + $0x38] sm:$0xff] %v485_v58  ;;  %529 = vst [vmem:[%s900_s5 + $0x98] sm:$0xff] %v497_v59  ;;  %v486_v1 = vmax.f32 %v408_v60, 0.0  ;;  %v498_v2 = vmax.f32 %v444_v61, 0.0  ;;  %v410_v6 = vadd.f32 %v409_v62, %v789_v4  ;;  %v446_v7 = vadd.f32 %v445_v63, %v234_v51 }
 0x1b1   :  { %v413_v8 = vpop.f32.mrf.mxu0  ;;  %v449_v9 = vpop.f32.mrf.mxu1 }
 0x1b2   :  { %518 = vst [vmem:[%s900_s5 + $0x40] sm:$0xff] %v486_v1  ;;  %530 = vst [vmem:[%s900_s5 + $0xa0] sm:$0xff] %v498_v2  ;;  %v487_v3 = vmax.f32 %v410_v6, 0.0  ;;  %v499_v10 = vmax.f32 %v446_v7, 0.0  ;;  %v414_v11 = vadd.f32 %v413_v8, %v791_v5  ;;  %v450_v12 = vadd.f32 %v449_v9, %v239_v0 }
 0x1b3   :  { %v415_v13 = vpop.f32.mrf.mxu0  ;;  %v451_v14 = vpop.f32.mrf.mxu1 }
 0x1b4   :  { %519 = vst [vmem:[%s900_s5 + $0x48] sm:$0xff] %v487_v3  ;;  %531 = vst [vmem:[%s900_s5 + $0xa8] sm:$0xff] %v499_v10  ;;  %v488_v4 = vmax.f32 %v414_v11, 0.0  ;;  %v500_v15 = vmax.f32 %v450_v12, 0.0  ;;  %v416_v16 = vadd.f32 %v415_v13, %v791_v5  ;;  %v452_v17 = vadd.f32 %v451_v14, %v239_v0 }
 0x1b5   :  { %v455_v19 = vpop.f32.mrf.mxu1 }
 0x1b6   :  { %520 = vst [vmem:[%s900_s5 + $0x50] sm:$0xff] %v488_v4  ;;  %532 = vst [vmem:[%s900_s5 + $0xb0] sm:$0xff] %v500_v15  ;;  %v489_v20 = vmax.f32 %v416_v16, 0.0  ;;  %v501_v21 = vmax.f32 %v452_v17, 0.0  ;;  %v456_v22 = vadd.f32 %v455_v19, %v244_v18 }
 0x1b7   :  { %v457_v23 = vpop.f32.mrf.mxu1 }
 0x1b8   :  { %521 = vst [vmem:[%s900_s5 + $0x58] sm:$0xff] %v489_v20  ;;  %533 = vst [vmem:[%s900_s5 + $0xb8] sm:$0xff] %v501_v21  ;;  %v502_v5 = vmax.f32 %v456_v22, 0.0  ;;  %v458_v24 = vadd.f32 %v457_v23, %v244_v18 }
 0x1b9   :  { %v461_v26 = vpop.f32.mrf.mxu1 }
 0x1ba   :  { %534 = vst [vmem:[%s900_s5 + $0xc0] sm:$0xff] %v502_v5  ;;  %v503_v27 = vmax.f32 %v458_v24, 0.0  ;;  %v462_v28 = vadd.f32 %v461_v26, %v249_v25 }
 0x1bb   :  { %v463_v29 = vpop.f32.mrf.mxu1 }
 0x1bc   :  { %535 = vst [vmem:[%s900_s5 + $0xc8] sm:$0xff] %v503_v27  ;;  %v504_v30 = vmax.f32 %v462_v28, 0.0  ;;  %v464_v31 = vadd.f32 %v463_v29, %v249_v25 }
 0x1bd   :  { %v467_v33 = vpop.f32.mrf.mxu1 }
 0x1be   :  { %536 = vst [vmem:[%s900_s5 + $0xd0] sm:$0xff] %v504_v30  ;;  %v505_v34 = vmax.f32 %v464_v31, 0.0  ;;  %v468_v35 = vadd.f32 %v467_v33, %v254_v32 }
 0x1bf   :  { %v469_v36 = vpop.f32.mrf.mxu1 }
 0x1c0   :  { %537 = vst [vmem:[%s900_s5 + $0xd8] sm:$0xff] %v505_v34  ;;  %v506_v37 = vmax.f32 %v468_v35, 0.0  ;;  %v470_v38 = vadd.f32 %v469_v36, %v254_v32 }
 0x1c1   :  { %v473_v40 = vpop.f32.mrf.mxu1 }
 0x1c2   :  { %538 = vst [vmem:[%s900_s5 + $0xe0] sm:$0xff] %v506_v37  ;;  %v507_v41 = vmax.f32 %v470_v38, 0.0  ;;  %v474_v42 = vadd.f32 %v473_v40, %v259_v39 }
 0x1c3   :  { %v475_v43 = vpop.f32.mrf.mxu1 }
 0x1c4   :  { %539 = vst [vmem:[%s900_s5 + $0xe8] sm:$0xff] %v507_v41  ;;  %v508_v44 = vmax.f32 %v474_v42, 0.0  ;;  %v476_v45 = vadd.f32 %v475_v43, %v259_v39 }
 0x1c6   :  { %540 = vst [vmem:[%s900_s5 + $0xf0] sm:$0xff] %v508_v44  ;;  %v509_v46 = vmax.f32 %v476_v45, 0.0 }
 0x1c8   :  { %541 = vst [vmem:[%s900_s5 + $0xf8] sm:$0xff] %v509_v46 }

</bundles_post_ra>
